<compile_context>
chip_gen: v7x
topology: tpu7x:2x2x1
jax: 0.10.0
libtpu: 0.0.40
codegen_flags: <defaults>
</compile_context>

<pallas_src>
import jax
import jax.numpy as jnp
from jax.experimental import pallas as pl
from jax.experimental.pallas import tpu as pltpu


def _round_up(a: int, b: int) -> int:
    return (a + b - 1) // b * b


def _sage_hetero_kernel(a_ref, xs_ref, xd_ref, wn_ref, ws_ref, o_ref, agg_ref):
    # grid = (m, k, r); m parallel, k/r arbitrary (sequential accumulation).
    k = pl.program_id(1)
    r = pl.program_id(2)
    nk = pl.num_programs(1)
    fin = wn_ref.shape[0]  # static

    # Once per dst tile: init the resident f32 output block with the hoisted
    # self-term X_m @ (sum_r W_self_r); the relation-summed bias is folded into
    # the last weight row and picked up by the ones column of xd.  Also zero
    # every relation's k-accumulator.
    @pl.when(jnp.logical_and(k == 0, r == 0))
    def _():
        o_ref[...] = jnp.dot(xd_ref[...], ws_ref[...],
                             preferred_element_type=jnp.float32)
        agg_ref[...] = jnp.zeros_like(agg_ref)

    # Accumulate A_r @ [X | 1] over src tiles.  The appended ones column makes
    # the in-degree ride the (underutilized) MXU instead of a per-step VPU cast
    # plus XLU cross-lane reduce.
    agg_ref[r] += jnp.dot(a_ref[...], xs_ref[...],
                          preferred_element_type=jnp.float32)

    # Finalize relation r once per dst tile: mean aggregation + W_neigh matmul.
    @pl.when(k == nk - 1)
    def _():
        acc = agg_ref[r]                              # (tm, Fin + 1) f32
        deg = jnp.maximum(acc[:, fin:], 1.0)          # (tm, 1)
        neigh = (acc[:, :fin] / deg).astype(jnp.bfloat16)
        o_ref[...] += jnp.dot(neigh, wn_ref[...],
                              preferred_element_type=jnp.float32)


def gnn_conv_1layer(adj, x, w_self, w_neigh, bias, *,
                    tm_target=512, tk_target=2048,
                    vmem_budget=48 * 1024 * 1024):
    """adj: (R, N, N) {0,1}; x: (N, Fin); w_*: (R, Fin, Fout); bias: (R, 1, Fout)."""
    R, N, _ = adj.shape
    Fin = x.shape[1]
    Fout = w_self.shape[2]
    Fa = Fin + 1                       # features + ones column (degree via MXU)
    Fp = _round_up(Fout, 128)          # lane-dense output

    # ---- Hoist self weights + bias out of the relation loop (exact algebra) ----
    ws_sum = jnp.sum(w_self.astype(jnp.float32), axis=0)            # (Fin, Fout)
    b_sum = jnp.sum(bias.astype(jnp.float32), axis=0).reshape(1, Fout)
    ws_aug = jnp.concatenate([ws_sum, b_sum], axis=0)               # (Fa, Fout)
    ws_aug = jnp.pad(ws_aug, ((0, 0), (0, Fp - Fout))).astype(jnp.bfloat16)
    wn_p = jnp.pad(w_neigh, ((0, 0), (0, 0), (0, Fp - Fout))).astype(jnp.bfloat16)

    # ---- Tile selection: big streaming tiles, shrunk to fit a VMEM budget ----
    if N <= tm_target:
        tm = _round_up(N, 8)
    else:
        tm = tm_target
        nt = -(-N // tm)
        if nt % 2:                      # keep an even dst-tile count (v7x 2-TC balance)
            nt += 1
            tm = _round_up(-(-N // nt), 8)
    # src axis rounded to 128 lanes even for small N (unmasked lane loads)
    tk = _round_up(N, 128) if N <= tk_target else tk_target

    def _working_set(tm_, tk_):
        return (2 * tm_ * tk_ * 2          # adjacency tile, double-buffered bf16
                + 2 * tk_ * Fa * 2         # [X|1] src tile
                + 2 * tm_ * Fa * 2         # [X|1] dst tile
                + 2 * Fin * Fp * 2         # W_neigh_r
                + 2 * Fa * Fp * 2          # summed self weights (+bias row)
                + 2 * tm_ * Fp * 4         # resident f32 output block
                + R * tm_ * Fa * 4)        # per-relation accumulators

    while _working_set(tm, tk) > vmem_budget and tk > 512:
        tk = max(512, _round_up(tk // 2, 128))
    while _working_set(tm, tk) > vmem_budget and tm > 128:
        tm = max(128, _round_up(tm // 2, 8))

    n_dst = _round_up(N, tm)
    n_src = _round_up(N, tk)
    n_rows = max(n_dst, n_src)

    # ---- One shared augmented feature array [X | 1] for src and dst streams ----
    x_aug = jnp.concatenate([x, jnp.ones((N, 1), x.dtype)], axis=1)
    x_aug = jnp.pad(x_aug, ((0, n_rows - N), (0, 0))).astype(jnp.bfloat16)

    # bf16 adjacency is exact for 0/1 and halves the dominant HBM stream.
    # TODO(synk): for production, store adj block-padded bf16 (or a block-sparse
    # nonzero-block list consumed via scalar prefetch) upstream to avoid this pre-pass.
    adj_p = adj if adj.dtype == jnp.bfloat16 else adj.astype(jnp.bfloat16)
    if n_dst != N or n_src != N:
        adj_p = jnp.pad(adj_p, ((0, 0), (0, n_dst - N), (0, n_src - N)))

    grid = (n_dst // tm, n_src // tk, R)

    grid_spec = pltpu.PrefetchScalarGridSpec(
        num_scalar_prefetch=0,
        grid=grid,
        in_specs=[
            # adjacency tile (dst x src) of relation r
            pl.BlockSpec((pl.Squeezed(), tm, tk), lambda m, k, r: (r, m, k)),
            # [X | 1] src tile (block index independent of r -> no R-fold re-fetch)
            pl.BlockSpec((tk, Fa), lambda m, k, r: (k, 0)),
            # [X | 1] dst tile (self term + bias pickup)
            pl.BlockSpec((tm, Fa), lambda m, k, r: (m, 0)),
            # per-relation neighbor weights
            pl.BlockSpec((pl.Squeezed(), Fin, Fp), lambda m, k, r: (r, 0, 0)),
            # relation-summed self weights with bias folded into last row
            pl.BlockSpec((Fa, Fp), lambda m, k, r: (0, 0)),
        ],
        out_specs=pl.BlockSpec((tm, Fp), lambda m, k, r: (m, 0)),
        scratch_shapes=[
            pltpu.VMEM((R, tm, Fa), jnp.float32),   # per-relation neighbor+degree acc
        ],
    )

    est = _working_set(tm, tk)
    vmem_limit = min(100 * 1024 * 1024,
                     max(32 * 1024 * 1024, int(est * 1.5) + (8 << 20)))

    out = pl.pallas_call(
        _sage_hetero_kernel,
        out_shape=jax.ShapeDtypeStruct((n_dst, Fp), jnp.float32),
        grid_spec=grid_spec,
        compiler_params=pltpu.CompilerParams(
            # dst-tile axis splits across TensorCores; src and relation axes
            # accumulate into the resident output block / scratch (never parallel).
            dimension_semantics=("parallel", "arbitrary", "arbitrary"),
            vmem_limit_bytes=vmem_limit,
        ),
    )(adj_p, x_aug, x_aug, wn_p, ws_aug)

    return out[:N, :Fout]


def reference(adj, x, w_self, w_neigh, bias):
    deg = jnp.sum(adj, axis=-1, keepdims=True)                    # (R, N, 1)
    neigh = (adj @ x) / jnp.maximum(deg, 1.0)                     # (R, N, Fin)
    h = jnp.einsum("nf,rfo->rno", x, w_self) + jnp.einsum("rnf,rfo->rno", neigh, w_neigh)
    h = h + bias
    return jnp.sum(h, axis=0)


if __name__ == "__main__":
    # Small deterministic setup: 3 relations, 16 nodes, in_feats=32, out_feats=8.
    R, N, FIN, FOUT = 3, 16, 32, 8

    key = jax.random.PRNGKey(0)
    k_adj, k_x, k_ws, k_wn, k_b = jax.random.split(key, 5)

    adj = jax.random.bernoulli(k_adj, p=0.3, shape=(R, N, N)).astype(jnp.float32)
    x = jax.random.normal(k_x, (N, FIN), dtype=jnp.float32)
    w_self = jax.random.normal(k_ws, (R, FIN, FOUT), dtype=jnp.float32) * 0.1
    w_neigh = jax.random.normal(k_wn, (R, FIN, FOUT), dtype=jnp.float32) * 0.1
    bias = jax.random.normal(k_b, (R, 1, FOUT), dtype=jnp.float32) * 0.01

    out = gnn_conv_1layer(adj, x, w_self, w_neigh, bias)
    out = jax.block_until_ready(out)

    ref = reference(adj, x, w_self, w_neigh, bias)
    assert out.shape == (N, FOUT)
    # bf16 MXU operands => tolerance loosened vs f32 reference (degree division is exact).
    assert jnp.allclose(out, ref, atol=5e-2, rtol=5e-2), "mismatch vs reference"

    print("KERNEL_OK")
</pallas_src>

<mosaic_0001>
module attributes {stable_mosaic.version = 11 : i64} {
  func.func @_sage_hetero_kernel(%arg0: i32, %arg1: i32, %arg2: i32, %arg3: memref<1x16x128xbf16, #tpu.memory_space<vmem>>, %arg4: memref<128x33xbf16, #tpu.memory_space<vmem>>, %arg5: memref<16x33xbf16, #tpu.memory_space<vmem>>, %arg6: memref<1x32x128xbf16, #tpu.memory_space<vmem>>, %arg7: memref<33x128xbf16, #tpu.memory_space<vmem>>, %arg8: memref<16x128xf32, #tpu.memory_space<vmem>>, %arg9: memref<3x16x33xf32, #tpu.memory_space<vmem>>) attributes {dimension_semantics = [#tpu.dimension_semantics<parallel>, #tpu.dimension_semantics<arbitrary>, #tpu.dimension_semantics<arbitrary>], iteration_bounds = array<i64: 1, 1, 3>, scalar_prefetch = 0 : i64, scratch_operands = 1 : i64, tpu.core_type = #tpu.core_type<tc>, window_params = [{transform_indices = @transform_0, window_bounds = array<i64: 1, 16, 128>}, {transform_indices = @transform_1, window_bounds = array<i64: 128, 33>}, {transform_indices = @transform_2, window_bounds = array<i64: 16, 33>}, {transform_indices = @transform_3, window_bounds = array<i64: 1, 32, 128>}, {pipeline_mode = #tpu.pipeline_mode<synchronous>, transform_indices = @transform_4, window_bounds = array<i64: 33, 128>}, {transform_indices = @transform_5, window_bounds = array<i64: 16, 128>}]} {
    %c0_i32 = arith.constant 0 : i32
    %0 = arith.cmpi eq, %arg1, %c0_i32 : i32
    %c0_i32_0 = arith.constant 0 : i32
    %1 = arith.cmpi eq, %arg2, %c0_i32_0 : i32
    %2 = arith.andi %0, %1 : i1
    %3 = arith.extui %2 : i1 to i32
    %c0_i32_1 = arith.constant 0 : i32
    %4 = arith.cmpi ne, %3, %c0_i32_1 : i32
    scf.if %4 {
      %c0_12 = arith.constant 0 : index
      %c0_13 = arith.constant 0 : index
      %20 = vector.load %arg5[%c0_12, %c0_13] : memref<16x33xbf16, #tpu.memory_space<vmem>>, vector<16x33xbf16>
      %c0_14 = arith.constant 0 : index
      %c0_15 = arith.constant 0 : index
      %21 = vector.load %arg7[%c0_14, %c0_15] : memref<33x128xbf16, #tpu.memory_space<vmem>>, vector<33x128xbf16>
      %cst_16 = arith.constant dense<0.000000e+00> : vector<16x128xf32>
      %22 = tpu.matmul %20, %21, %cst_16 {dimension_numbers = #tpu.dot_dimension_numbers<[1], [0], [0], [1], [0, 0, 1, 1], [], []>} : vector<16x33xbf16>, vector<33x128xbf16>, vector<16x128xf32> -> vector<16x128xf32>
      %c0_17 = arith.constant 0 : index
      %c0_18 = arith.constant 0 : index
      %23 = vector.load %arg8[%c0_17, %c0_18] : memref<16x128xf32, #tpu.memory_space<vmem>>, vector<16x128xf32>
      tpu.vector_store %arg8[%c0_17, %c0_18], %22 {strides = array<i32>} : memref<16x128xf32, #tpu.memory_space<vmem>>, vector<16x128xf32>,
      %cst_19 = arith.constant 0.000000e+00 : f32
      %24 = vector.broadcast %cst_19 : f32 to vector<3x16x33xf32>
      %c0_20 = arith.constant 0 : index
      %c0_21 = arith.constant 0 : index
      %c0_22 = arith.constant 0 : index
      %25 = vector.load %arg9[%c0_20, %c0_21, %c0_22] : memref<3x16x33xf32, #tpu.memory_space<vmem>>, vector<3x16x33xf32>
      tpu.vector_store %arg9[%c0_20, %c0_21, %c0_22], %24 {strides = array<i32>} : memref<3x16x33xf32, #tpu.memory_space<vmem>>, vector<3x16x33xf32>,
    } else {
    }
    %5 = arith.index_cast %arg2 : i32 to index
    %c0 = arith.constant 0 : index
    %c0_2 = arith.constant 0 : index
    %6 = vector.load %arg9[%5, %c0, %c0_2] : memref<3x16x33xf32, #tpu.memory_space<vmem>>, vector<1x16x33xf32>
    %7 = vector.shape_cast %6 : vector<1x16x33xf32> to vector<16x33xf32>
    %c0_3 = arith.constant 0 : index
    %c0_4 = arith.constant 0 : index
    %c0_5 = arith.constant 0 : index
    %8 = vector.load %arg3[%c0_3, %c0_4, %c0_5] : memref<1x16x128xbf16, #tpu.memory_space<vmem>>, vector<1x16x128xbf16>
    %9 = vector.shape_cast %8 : vector<1x16x128xbf16> to vector<16x128xbf16>
    %c0_6 = arith.constant 0 : index
    %c0_7 = arith.constant 0 : index
    %10 = vector.load %arg4[%c0_6, %c0_7] : memref<128x33xbf16, #tpu.memory_space<vmem>>, vector<128x33xbf16>
    %cst = arith.constant dense<0.000000e+00> : vector<16x33xf32>
    %11 = tpu.matmul %9, %10, %cst {dimension_numbers = #tpu.dot_dimension_numbers<[1], [0], [0], [1], [0, 0, 1, 1], [], []>} : vector<16x128xbf16>, vector<128x33xbf16>, vector<16x33xf32> -> vector<16x33xf32>
    %12 = arith.addf %7, %11 : vector<16x33xf32>
    %13 = arith.index_cast %arg2 : i32 to index
    %c0_8 = arith.constant 0 : index
    %c0_9 = arith.constant 0 : index
    %14 = vector.load %arg9[%13, %c0_8, %c0_9] : memref<3x16x33xf32, #tpu.memory_space<vmem>>, vector<1x16x33xf32>
    %15 = vector.shape_cast %14 : vector<1x16x33xf32> to vector<16x33xf32>
    %16 = vector.shape_cast %12 : vector<16x33xf32> to vector<1x16x33xf32>
    tpu.vector_store %arg9[%13, %c0_8, %c0_9], %16 {strides = array<i32>} : memref<3x16x33xf32, #tpu.memory_space<vmem>>, vector<1x16x33xf32>,
    %c0_i32_10 = arith.constant 0 : i32
    %17 = arith.cmpi eq, %arg1, %c0_i32_10 : i32
    %18 = arith.extui %17 : i1 to i32
    %c0_i32_11 = arith.constant 0 : i32
    %19 = arith.cmpi ne, %18, %c0_i32_11 : i32
    scf.if %19 {
      %20 = arith.index_cast %arg2 : i32 to index
      %c0_12 = arith.constant 0 : index
      %c0_13 = arith.constant 0 : index
      %21 = vector.load %arg9[%20, %c0_12, %c0_13] : memref<3x16x33xf32, #tpu.memory_space<vmem>>, vector<1x16x33xf32>
      %22 = vector.shape_cast %21 : vector<1x16x33xf32> to vector<16x33xf32>
      %23 = vector.extract_strided_slice %22 {offsets = [0, 32], sizes = [16, 1], strides = [1, 1]} : vector<16x33xf32> to vector<16x1xf32>
      %cst_14 = arith.constant 1.000000e+00 : f32
      %24 = vector.broadcast %cst_14 : f32 to vector<16x1xf32>
      %25 = arith.maximumf %23, %24 : vector<16x1xf32>
      %26 = vector.extract_strided_slice %22 {offsets = [0, 0], sizes = [16, 32], strides = [1, 1]} : vector<16x33xf32> to vector<16x32xf32>
      %27 = vector.broadcast %25 : vector<16x1xf32> to vector<16x32xf32>
      %28 = arith.divf %26, %27 : vector<16x32xf32>
      %29 = arith.truncf %28 : vector<16x32xf32> to vector<16x32xbf16>
      %c0_15 = arith.constant 0 : index
      %c0_16 = arith.constant 0 : index
      %30 = vector.load %arg8[%c0_15, %c0_16] : memref<16x128xf32, #tpu.memory_space<vmem>>, vector<16x128xf32>
      %c0_17 = arith.constant 0 : index
      %c0_18 = arith.constant 0 : index
      %c0_19 = arith.constant 0 : index
      %31 = vector.load %arg6[%c0_17, %c0_18, %c0_19] : memref<1x32x128xbf16, #tpu.memory_space<vmem>>, vector<1x32x128xbf16>
      %32 = vector.shape_cast %31 : vector<1x32x128xbf16> to vector<32x128xbf16>
      %cst_20 = arith.constant dense<0.000000e+00> : vector<16x128xf32>
      %33 = tpu.matmul %29, %32, %cst_20 {dimension_numbers = #tpu.dot_dimension_numbers<[1], [0], [0], [1], [0, 0, 1, 1], [], []>} : vector<16x32xbf16>, vector<32x128xbf16>, vector<16x128xf32> -> vector<16x128xf32>
      %34 = arith.addf %30, %33 : vector<16x128xf32>
      %c0_21 = arith.constant 0 : index
      %c0_22 = arith.constant 0 : index
      %35 = vector.load %arg8[%c0_21, %c0_22] : memref<16x128xf32, #tpu.memory_space<vmem>>, vector<16x128xf32>
      tpu.vector_store %arg8[%c0_21, %c0_22], %34 {strides = array<i32>} : memref<16x128xf32, #tpu.memory_space<vmem>>, vector<16x128xf32>,
    } else {
    }
    return
  }
  func.func @transform_0(%arg0: i32, %arg1: i32, %arg2: i32) -> (i32, i32, i32) {
    %c0_i32 = arith.constant 0 : i32
    return %arg2, %arg0, %arg1 : i32, i32, i32
  }
  func.func @transform_1(%arg0: i32, %arg1: i32, %arg2: i32) -> (i32, i32) {
    %c0_i32 = arith.constant 0 : i32
    %c0_i32_0 = arith.constant 0 : i32
    return %arg1, %c0_i32 : i32, i32
  }
  func.func @transform_2(%arg0: i32, %arg1: i32, %arg2: i32) -> (i32, i32) {
    %c0_i32 = arith.constant 0 : i32
    %c0_i32_0 = arith.constant 0 : i32
    return %arg0, %c0_i32 : i32, i32
  }
  func.func @transform_3(%arg0: i32, %arg1: i32, %arg2: i32) -> (i32, i32, i32) {
    %c0_i32 = arith.constant 0 : i32
    %c0_i32_0 = arith.constant 0 : i32
    %c0_i32_1 = arith.constant 0 : i32
    return %arg2, %c0_i32, %c0_i32_0 : i32, i32, i32
  }
  func.func @transform_4(%arg0: i32, %arg1: i32, %arg2: i32) -> (i32, i32) {
    %c0_i32 = arith.constant 0 : i32
    %c0_i32_0 = arith.constant 0 : i32
    %c0_i32_1 = arith.constant 0 : i32
    return %c0_i32, %c0_i32_0 : i32, i32
  }
  func.func @transform_5(%arg0: i32, %arg1: i32, %arg2: i32) -> (i32, i32) {
    %c0_i32 = arith.constant 0 : i32
    %c0_i32_0 = arith.constant 0 : i32
    return %arg0, %c0_i32 : i32, i32
  }
}

</mosaic_0001>

<bundles_post_ra>
// kernel: tpu_custom_call.1
= control target key start
LH: loop header
LB: loop body
LE: loop exit
PB: predicated region body
PF: predicated region fallthrough
CT: control target
= control target key end

     0   :  { %10 = vsyncpa [#allocation4], 0  ;;  %s991_s18 = smov 0   ;;  %s993_s19 = smov 0   ;;  %s1102_s0 = inlined_call_operand.vmem [shape: bf16[3,16,128], index: 0, kind: input, shape index: {}]   ;;  %s1103_s1 = inlined_call_operand.vmem [shape: bf16[128,33], index: 1, kind: input, shape index: {}]   ;;  %s1104_s2 = inlined_call_operand.vmem [shape: bf16[128,33], index: 2, kind: input, shape index: {}]   ;;  %s1105_s3 = inlined_call_operand.vmem [shape: bf16[3,32,128], index: 3, kind: input, shape index: {}]   ;;  %s1106_s4 = inlined_call_operand.vmem [shape: bf16[33,128], index: 4, kind: input, shape index: {}]   ;;  %s1107_s5 = inlined_call_operand.hbm [shape: f32[16,128], index: 5, kind: output, shape index: {}]  }
   0x1   :  { %s995_s20 = smov 0  }
   0x2 LB: > { %s749_s21 = sadd.s32 4294967295, %s950_s20   ;;  %s28_s22 = sadd.s32 1, %s946_s19  ;;  %s950_s20 = sphi %s995_s20, %s16_s20   ;;  %s946_s19 = sphi %s993_s19, %s1110_s19   ;;  %s942_s18 = sphi %s991_s18, %s1109_s18  }
   0x3   : > { %p29_p0 = scmp.ge.s32.totalorder %s28_s22, 3  ;;  %p754_p1 = scmp.ge.s32.totalorder %s950_s20, 1 }
   0x4   : > { %p251_p2 = scmp.lt.s32.totalorder %s950_s20, 4 }
   0x5   : > { %s1112_s22 = smov (%p29_p0, %s28_s22), 0 }
   0x6   : > { %p252_p3 = pnand %p754_p1, %p251_p2 }
   0x7   : > { %p297_p4 = scmp.lt.s32.totalorder (!%p252_p3), %s942_s18, 2  ;;  %p329_p5 = scmp.eq.s32.totalorder (!%p252_p3), %s942_s18, 0 }
   0x8   : > { %255 = sbr.rel (%p252_p3) target bundleno = 880 (0x370), region = 40 }
   0xf   : > { %s298_s23 = scalar_select %p297_p4, %s942_s18, 2 }
  0x10   : > { %333 = sbr.rel (!%p329_p5) target bundleno = 244 (0xf4), region = 44  ;;  %v878_v0 = vld [vmem:[%s1106_s4] sm:$0xff] (%p329_p5)   ;;  %v952_v1 = vmov (%p329_p5), 0.0   ;;  %v879_v2 = vld [vmem:[%s1106_s4 + $0x8] sm:$0xff] (%p329_p5)   ;;  %vm365_vm0 = vcmask (%p329_p5), 1040384   ;;  %v953_v4 = vmov (%p329_p5), 0  }
  0x11   : > { %s782_s24 = sshll.u32 %s298_s23, 3  ;;  %s783_s25 = sshll.u32 %s298_s23, 4  ;;  %801 = vmatprep.subr.bf16.mxu0 (%p329_p5), %v952_v1  ;;  %v880_v3 = vld [vmem:[%s1106_s4 + $0x10] ss:$0 sps:$4 sm:$0x11] (%p329_p5)   ;;  %v367_v5 = vsel (%p329_p5), %vm365_vm0, 65535, %v953_v4 }
  0x12   : > { %s1018_s28 = scalar_lea.vmem %s1102_s0, %s782_s24  ;;  %s1023_s6 = scalar_lea.vmem %s1105_s3, %s783_s25  ;;  %802 = vmatpush3.bf16.msra.mxu0 (%p329_p5), %v878_v0  ;;  %vm954_vm1 = vmmov (%p329_p5), 0   ;;  %vm361_vm2 = vcmask (%p329_p5), 269312   ;;  %v369_v6 = vand.u32 (%p329_p5), %v880_v3, %v367_v5  ;;  %v881_v7 = vld [vmem:[%s1104_s2] sm:$0xff] (%p329_p5)  }
  0x13   : > { %803 = vmatprep.subr.bf16.mxu0 (%p329_p5), %v952_v1  ;;  %807 = vmatprep.mubr.msk.bf16.mxu0 (%p329_p5), %vm954_vm1, %v952_v1  ;;  %414 = vst.msk [vmem:[#allocation2] sm:$0xff] (%p329_p5), %vm361_vm2, %v952_v1  ;;  %415 = vst.msk [vmem:[#allocation2 + $0x8] sm:$0xff] (%p329_p5), %vm361_vm2, %v952_v1 }
  0x14   : > { %416 = vst.msk [vmem:[#allocation2 + $0x10] sm:$0xff] (%p329_p5), %vm361_vm2, %v952_v1  ;;  %417 = vst.msk [vmem:[#allocation2 + $0x18] sm:$0xff] (%p329_p5), %vm361_vm2, %v952_v1 }
  0x15   : > { %418 = vst.msk [vmem:[#allocation2 + $0x20] sm:$0xff] (%p329_p5), %vm361_vm2, %v952_v1  ;;  %419 = vst.msk [vmem:[#allocation2 + $0x28] sm:$0xff] (%p329_p5), %vm361_vm2, %v952_v1 }
  0x16   : > { %804 = vmatpush3.bf16.msra.mxu0 (%p329_p5), %v879_v2 }
  0x17   : > { %805 = vmatprep.subr.bf16.mxu0 %v952_v1 }
  0x1a   : > { %806 = vmatpush3.bf16.msra.mxu0 %v369_v6 }
  0x1d   : > { %808 = vmatmul.mubr.msk.bf16.vlgmr.msra.gmra.mrb[0].mxu0 %vm361_vm2, %v881_v7 }
  0xf0   : > { %v405_v8 = vpop.f32.mrb[0].mxu0 }
  0xf1   : > { %412 = vst [vmem:[#allocation3] sm:$0xff] %v405_v8  ;;  %v809_v9 = vpop.f32.mrb[1].mxu0 }
  0xf2   : > { %v408_v10 = vpop.f32.mrb[2].mxu0 }
  0xf3   : > { %413 = vst [vmem:[#allocation3 + $0x8] sm:$0xff] %v408_v10  ;;  %v810_v11 = vpop.f32.mrb[3].mxu0 }
  0xf4 PF: > { %v883_v12 = vld [vmem:[%s1103_s1] sm:$0xff]   ;;  %v955_v13 = vmov 0.0   ;;  %v884_v14 = vld [vmem:[%s1103_s1 + $0x8] sm:$0xff]   ;;  %vm956_vm3 = vmmov 0   ;;  %v885_v15 = vld [vmem:[%s1103_s1 + $0x10] sm:$0xff]   ;;  %v957_v22 = vmov 32  }
  0xf5   : > { %811 = vmatprep.subr.bf16.mxu0 %v955_v13  ;;  %831 = vmatprep.subr.bf16.mxu1 %v955_v13  ;;  %v886_v16 = vld [vmem:[%s1103_s1 + $0x18] sm:$0xff]   ;;  %v887_v17 = vld [vmem:[%s1103_s1 + $0x20] sm:$0xff]   ;;  %v888_v18 = vld [vmem:[%s1103_s1 + $0x28] sm:$0xff]   ;;  %s765_s13 = sshll.u32 %s942_s18, 4  ;;  %vm539_vm4 = vcmask 269312   ;;  %vm582_vm5 = vcmask 261120  }
  0xf6   : > { %812 = vmatpush3.bf16.msra.mxu0 %v883_v12  ;;  %827 = vmatprep.mubr.msk.bf16.mxu0 %vm956_vm3, %v955_v13  ;;  %v889_v19 = vld [vmem:[%s1103_s1 + $0x30] sm:$0xff]   ;;  %v890_v20 = vld [vmem:[%s1103_s1 + $0x38] sm:$0xff]   ;;  %v891_v21 = vld [vmem:[%s1018_s28] sm:$0xff]   ;;  %s421_s14 = scalar_lea.vmem [#allocation2], %s765_s13  ;;  %s958_s18 = smov [#allocation3]  }
  0xf7   : > { %813 = vmatprep.subr.bf16.mxu0 %v955_v13  ;;  %835 = vmatprep.mubr.msk.bf16.mxu1 %vm956_vm3, %v955_v13  ;;  %v892_v35 = vld [vmem:[%s1023_s6] sm:$0xff]   ;;  %v893_v36 = vld [vmem:[%s1023_s6 + $0x8] sm:$0xff]   ;;  %s640_s28 = sshll.u32 %s958_s18, 4  ;;  %p1067_p6 = scmp.eq.s32.totalorder %s749_s21, 2  ;;  %s641_s28 = int_to_ptr.vmem [resolvable:$true] %s640_s28 }
  0xf8   : > { %882 = vset.pattern.permute.xlu0 %v957_v22  ;;  %832 = vmatpush3.bf16.msra.mxu1 %v892_v35  ;;  %v564_v44 = vld [vmem:[#allocation3] sm:$0xff]  ;;  %s898_s15 = scalar_lea.vmem %s641_s28, 256  ;;  %p905_p10 = scmp.lt.s32.totalorder %s641_s28, %s641_s28 }
  0xf9   : > { %v422_v23 = vld [vmem:[%s421_s14] sm:$0xff]  ;;  %v423_v25 = vld [vmem:[%s421_s14 + $0x8] sm:$0xff]  ;;  %833 = vmatprep.subr.bf16.mxu1 %v955_v13  ;;  %p899_p7 = scmp.ne.s32.totalorder %s641_s28, %s898_s15  ;;  %p906_p11 = scmp.lt.s32.totalorder %s898_s15, %s898_s15 }
  0xfa   : > { %814 = vmatpush3.bf16.msra.mxu0 %v884_v14  ;;  %v565_v46 = vld [vmem:[#allocation3 + $0x8] sm:$0xff] }
  0xfb   : > { %815 = vmatprep.subr.bf16.mxu0 %v955_v13  ;;  %p900_p8 = pnand %p899_p7, %p1067_p6  ;;  %p907_p12 = por %p906_p11, %p905_p10 }
  0xfc   : > { %834 = vmatpush3.bf16.msra.mxu1 %v893_v36 }
  0xfd   : > { %p901_p9 = pneg %p900_p8 }
  0xfe   : > { %816 = vmatpush3.bf16.msra.mxu0 %v885_v15 }
  0xff   : > { %817 = vmatprep.subr.bf16.mxu0 %v955_v13  ;;  %p908_p13 = pnand %p907_p12, %p901_p9 }
 0x102   : > { %818 = vmatpush3.bf16.msra.mxu0 %v886_v16 }
 0x103   : > { %819 = vmatprep.subr.bf16.mxu0 %v955_v13 }
 0x106   : > { %820 = vmatpush3.bf16.msra.mxu0 %v887_v17 }
 0x107   : > { %821 = vmatprep.subr.bf16.mxu0 %v955_v13 }
 0x10a   : > { %822 = vmatpush3.bf16.msra.mxu0 %v888_v18 }
 0x10b   : > { %823 = vmatprep.subr.bf16.mxu0 %v955_v13 }
 0x10e   : > { %824 = vmatpush3.bf16.msra.mxu0 %v889_v19 }
 0x10f   : > { %825 = vmatprep.subr.bf16.mxu0 %v955_v13 }
 0x112   : > { %826 = vmatpush3.bf16.msra.mxu0 %v890_v20 }
 0x115   : > { %828 = vmatmul.mubr.bf16.vlgmr.msra.gmra.mrb[0].mxu0 %v891_v21 }
 0x1e8   : > { %v530_v24 = vpop.f32.mrb[0].mxu0 }
 0x1e9   : > { %v537_v26 = vadd.f32 %v530_v24, %v422_v23  ;;  %v829_v27 = vpop.f32.mrb[1].mxu0 }
 0x1ea   : > { %v533_v28 = vpop.f32.mrb[2].mxu0 }
 0x1eb   : > { %540 = vst.msk [vmem:[%s421_s14] sm:$0xff] %vm539_vm4, %v537_v26  ;;  %v538_v29 = vadd.f32 %v533_v28, %v423_v25  ;;  %v830_v30 = vpop.f32.mrb[3].mxu0 }
 0x1ed   : > { %541 = vst.msk [vmem:[%s421_s14 + $0x8] sm:$0xff] %vm539_vm4, %v538_v29 }
 0x1f2   : > { %v545_v31 = vld [vmem:[%s421_s14] sm:$0xff] }
 0x1f3   : > { %v547_v32 = vmax.f32 %v545_v31, 1.0 }
 0x1f4   : > { %v546_v33 = vld [vmem:[%s421_s14 + $0x8] sm:$0xff] }
 0x1f5   : > { %551 = vperm.xlu0 %882, %v547_v32   ;;  %v548_v34 = vmax.f32 %v546_v33, 1.0 }
 0x1f9   : > { %556 = vperm.xlu0 %882, %v548_v34  }
 0x274   : > { %v552_v37 = vpop.permute.xlu0 %551 }
 0x275   : > { %894 = vrcp.f32 %v552_v37 }
 0x278   : > { %v557_v38 = vpop.permute.xlu0 %556 }
 0x279   : > { %896 = vrcp.f32 %v557_v38 }
 0x27f   : > { %v895_v39 = vpop.eup %894 }
 0x280   : > { %v560_v41 = vmul.f32 %v895_v39, %v545_v31 }
 0x283   : > { %v897_v40 = vpop.eup %896 }
 0x284   : > { %v562_v42 = vmul.f32 %v897_v40, %v546_v33 }
 0x286   : > { %v563_v43 = vpack.c.bf16 %v562_v42, %v560_v41 }
 0x288   : > { %836 = vmatmul.mubr.msk.bf16.vlgmr.msra.gmra.mrb[0].mxu1 %vm582_vm5, %v563_v43 }
 0x35b   : > { %v620_v45 = vpop.f32.mrb[0].mxu1 }
 0x35c   : > { %v627_v47 = vadd.f32 %v620_v45, %v564_v44  ;;  %v837_v48 = vpop.f32.mrb[1].mxu1 }
 0x35d   : > { %v623_v49 = vpop.f32.mrb[2].mxu1 }
 0x35e   : > { %629 = vst [vmem:[#allocation3] sm:$0xff] %v627_v47  ;;  %v628_v50 = vadd.f32 %v623_v49, %v565_v46  ;;  %v838_v51 = vpop.f32.mrb[3].mxu1 }
 0x360   : > { %630 = vst [vmem:[#allocation3 + $0x8] sm:$0xff] %v628_v50 }
 0x361   : > { %911 = shalt.err (!%p908_p13)
}
 0x362   : > { %s912_s17 = scalar_lea.hbm %s1107_s5, 256 }
 0x363   : > { %p913_p0 = scmp.ne.s32.totalorder %s1107_s5, %s912_s17  ;;  %p918_p3 = scmp.lt.u32.totalorder %s912_s17, %s1107_s5 }
 0x365   : > { %p914_p1 = pnand %p913_p0, %p1067_p6 }
 0x367   : > { %p915_p2 = pneg %p914_p1 }
 0x369   : > { %p920_p4 = pnand %p918_p3, %p915_p2 }
 0x36b   : > { %923 = shalt.err (!%p920_p4)
}
 0x36c   : > { %s959_s27 = smov 128   ;;  %s960_s29 = smov 8  }
 0x36d   : > { %840 = dma.vmem_to_hbm [thread:$0]  (%p1067_p6), %s641_s28, 256, %s1107_s5, [#allocation4], %s959_s27, %s959_s27, %s960_s29  }
 0x36e   : > { %937 = dma.done.wait (%p1067_p6), [#allocation4], 256  }
 0x36f   : > { %939 = vsyncadd (%p1067_p6), [#allocation4], 4294967040 }
 0x370 PF: > { %s16_s20 = sadd.s32 1, %s950_s20   ;;  %s1109_s18 = smov %s946_s19 }
 0x371   : > { %p13_p5 = scmp.ge.s32.totalorder %s16_s20, 5   ;;  %s1110_s19 = smov %s1112_s22 }
 0x373   :  { %15 = sbr.rel (!%p13_p5) target bundleno = 2 (0x2), region = 86 }
 0x37a   :  { %656 = vsyncpa [#allocation4], 1 }
 0x37b   :  { %658 = vsyncpa [#allocation4 + $0x1], 1 }

</bundles_post_ra>
